<compile_context>
chip_gen: v7x
topology: tpu7x:2x2x1
jax: 0.10.0
libtpu: 0.0.40
codegen_flags: <defaults>
</compile_context>

<pallas_src>
import math
import numpy as np
import jax
import jax.numpy as jnp
from jax.experimental import pallas as pl
from jax.experimental.pallas import tpu as pltpu

EPS = 1e-5  # PyTorch LayerNorm default eps
_VMEM_LIMIT = 32 * 1024 * 1024


# ----------------------------- in-kernel helpers -----------------------------
def _dot(a, b):
    return jnp.dot(a, b, preferred_element_type=jnp.float32)


def _sigmoid(x):
    return 1.0 / (1.0 + jnp.exp(-x))


def _silu(x):
    return x * _sigmoid(x)


def _softplus(x):
    return jnp.maximum(x, 0.0) + jnp.log1p(jnp.exp(-jnp.abs(x)))


def _layernorm(h, g, b):
    mu = jnp.mean(h, axis=-1, keepdims=True)
    var = jnp.mean((h - mu) ** 2, axis=-1, keepdims=True)
    return (h - mu) * jax.lax.rsqrt(var + EPS) * g + b


def _fullspec(shape):
    nd = len(shape)
    return pl.BlockSpec(shape, lambda *_: (0,) * nd)


def _cparams(sem):
    return pltpu.CompilerParams(dimension_semantics=sem,
                                vmem_limit_bytes=_VMEM_LIMIT)


# ----------------------------- Pallas kernels --------------------------------
def _mlp2_kernel(x_ref, W1, b1, g1, be1, W2, b2, g2, be2, W3, b3, o_ref):
    # mlp_depth=2: Linear -> LN -> ReLU -> Linear -> LN -> ReLU -> Linear
    h = x_ref[...]
    h = jnp.maximum(_layernorm(_dot(h, W1[...]) + b1[...], g1[...], be1[...]), 0.0)
    h = jnp.maximum(_layernorm(_dot(h, W2[...]) + b2[...], g2[...], be2[...]), 0.0)
    o_ref[...] = _dot(h, W3[...]) + b3[...]


def _readout_dec_kernel(pool_ref, x_ref, W1, b1, g1, be1, W2, b2, g2, be2, W3, b3, o_ref):
    # global_add_pool (one-hot matmul) fused with the decoder MLP (mlp_depth=2)
    h = _dot(pool_ref[...], x_ref[...])
    h = jnp.maximum(_layernorm(_dot(h, W1[...]) + b1[...], g1[...], be1[...]), 0.0)
    h = jnp.maximum(_layernorm(_dot(h, W2[...]) + b2[...], g2[...], be2[...]), 0.0)
    o_ref[...] = _dot(h, W3[...]) + b3[...]


def _make_layer_kernel(n_sc, n_graphs, T, Di, S, dconv):
    # One fused MultiScaleGambaLayer:
    #   n_sc SpatialConv passes + theta/alpha^T@x + Mamba + x_m broadcast
    #   + merge MLP + residual LayerNorm.
    def kernel(x_ref, dst_ref, src_ref, dstT_ref, poolT_ref, sob_ref, bnd_ref,
               # SpatialConv weights
               W1, b1, g1, be1, W2, b2, Wsob, bsob, Wbnd, bbnd, fng, fnb,
               # theta + Mamba weights
               Wth, WinX, WinZ, convw, convb, Wdt_f, bdt, WxB, WxC, Aneg, Dp, Wout,
               # merge MLP + post layer-norm weights
               Wm1, bm1, mg1, mbe1, Wm2, bm2, lg, lb,
               o_ref):
        x = x_ref[...]                               # (N, H) layer input == identity
        poolT = poolT_ref[...]                       # (N, B) one-hot graph membership
        dst_oh = dst_ref[...]                        # (E, N) gather of x_i (targets)
        src_oh = src_ref[...]                        # (E, N) gather of x_j (sources)
        dstT = dstT_ref[...]                         # (N, E) scatter-add to targets

        # ------------------ SpatialConv x n_sc (same conv reused) ------------------
        # edge gate is invariant across the n_sc passes -> hoisted out of the loop
        gate = _sigmoid(sob_ref[...] * Wsob[...] + bsob[...] +
                        bnd_ref[...] * Wbnd[...] + bbnd[...])
        pe = x
        for _ in range(n_sc):                        # static unroll
            xi = _dot(dst_oh, pe)                    # x[edge_index[1]]
            xj = _dot(src_oh, pe)                    # x[edge_index[0]]
            h = _dot(jnp.concatenate([xi, xj], axis=-1), W1[...]) + b1[...]   # (E,2H)@(2H,H)
            h = jnp.maximum(_layernorm(h, g1[...], be1[...]), 0.0)
            msg = (_dot(h, W2[...]) + b2[...]) * gate
            pe = _layernorm(pe + _dot(dstT, msg), fng[...], fnb[...])

        # --------------------- Mamba branch (static unroll over graphs) ------------
        alpha_full = _dot(x, Wth[...])               # (N, T) = theta(x) for all nodes
        A = Aneg[...]                                # (Di, S) = -exp(A_log), precomputed
        h0 = jnp.zeros((Di, S), jnp.float32)
        ys = []
        for b in range(n_graphs):
            m = poolT[:, b:b + 1]                    # (N, 1) node mask of graph b
            alpha = alpha_full * m                   # masked == theta(x_dense) rows
            # u = alpha^T @ x, contracting the node axis (no explicit transpose)
            u = jax.lax.dot_general(alpha, x, (((0,), (0,)), ((), ())),
                                    preferred_element_type=jnp.float32)   # (T, H)

            xin = _dot(u, WinX[...])                 # in_proj x-half (no bias), (T, Di)

            # causal depthwise conv1d (groups=Di) + bias: single zero-pad + static slices
            xp = jnp.concatenate([jnp.zeros((dconv - 1, Di), jnp.float32), xin], axis=0)
            conv = convb[...] + xp[0:T, :] * convw[0:1, :]
            for k in range(1, dconv):
                conv = conv + xp[k:k + T, :] * convw[k:k + 1, :]
            xc = _silu(conv)                         # (T, Di)

            dt = _softplus(_dot(xc, Wdt_f[...]) + bdt[...])   # (T, Di) (x_proj_dt@dt_proj fused)
            Bm = _dot(xc, WxB[...])                  # (T, S)
            Cm = _dot(xc, WxC[...])                  # (T, S)

            # batched discretization, hoisted off the serial scan chain
            dtx = dt * xc                                            # (T, Di)
            dA_all = jnp.exp(dt[:, :, None] * A[None, :, :])         # (T, Di, S)
            dBu_all = dtx[:, :, None] * Bm[:, None, :]               # (T, Di, S)

            h = h0
            for t in range(T):                       # only VPU fma on the serial chain
                h = dA_all[t] * h + dBu_all[t]

            # output of the LAST virtual token only (all that is used downstream)
            y = jax.lax.dot_general(Cm[T - 1:T, :], h, (((1,), (1,)), ((), ())),
                                    preferred_element_type=jnp.float32)      # (1, Di)
            y = y + Dp[...] * xc[T - 1:T, :]
            z = _dot(u[T - 1:T, :], WinZ[...])       # in_proj z-half, last token only
            ys.append(_dot(y * _silu(z), Wout[...])) # out_proj (no bias) -> (1, H)

        y_last = jnp.concatenate(ys, axis=0)         # (B, H)
        # x_m = x_mamba[batch][:, -1, :]  ==  pool_oh^T @ y_last
        xm = _dot(poolT, y_last)                     # (N, B) @ (B, H)

        # ----------------- merge([pe | x_m]) then LayerNorm(out + identity) --------
        h = _dot(jnp.concatenate([pe, xm], axis=-1), Wm1[...]) + bm1[...]
        h = jnp.maximum(_layernorm(h, mg1[...], mbe1[...]), 0.0)
        h = _dot(h, Wm2[...]) + bm2[...]
        o_ref[...] = _layernorm(h + x, lg[...], lb[...])
    return kernel


# ----------------------------- pallas_call wrappers ---------------------------
def enc_apply(p, x):
    args = (x, p['W1'], p['b1'], p['g1'], p['be1'], p['W2'], p['b2'],
            p['g2'], p['be2'], p['W3'], p['b3'])
    out_shape = jax.ShapeDtypeStruct((x.shape[0], p['W3'].shape[1]), jnp.float32)
    return pl.pallas_call(
        _mlp2_kernel,
        grid=(1,),
        in_specs=[_fullspec(a.shape) for a in args],
        out_specs=_fullspec(out_shape.shape),
        out_shape=out_shape,
        compiler_params=_cparams(("arbitrary",)),
    )(*args)


def readout_dec_apply(p, pool_oh, x):
    args = (pool_oh, x, p['W1'], p['b1'], p['g1'], p['be1'], p['W2'], p['b2'],
            p['g2'], p['be2'], p['W3'], p['b3'])
    out_shape = jax.ShapeDtypeStruct((pool_oh.shape[0], p['W3'].shape[1]), jnp.float32)
    return pl.pallas_call(
        _readout_dec_kernel,
        grid=(1,),
        in_specs=[_fullspec(a.shape) for a in args],
        out_specs=_fullspec(out_shape.shape),
        out_shape=out_shape,
        compiler_params=_cparams(("arbitrary",)),
    )(*args)


def layer_apply(lp, x, dst_oh, src_oh, dst_oh_T, pool_oh_T, sob, bnd):
    sc, mg = lp['sc'], lp['merge']
    B = pool_oh_T.shape[1]
    T = lp['Wth'].shape[1]
    Di = lp['WinX'].shape[1]
    S = lp['WxB'].shape[1]
    dconv = lp['convw'].shape[0]
    args = (x, dst_oh, src_oh, dst_oh_T, pool_oh_T, sob, bnd,
            sc['W1'], sc['b1'], sc['g1'], sc['be1'], sc['W2'], sc['b2'],
            sc['Wsob'], sc['bsob'], sc['Wbnd'], sc['bbnd'], sc['fng'], sc['fnb'],
            lp['Wth'], lp['WinX'], lp['WinZ'], lp['convw'], lp['convb'],
            lp['Wdt_f'], lp['bdt'], lp['WxB'], lp['WxC'], lp['Aneg'], lp['Dp'], lp['Wout'],
            mg['W1'], mg['b1'], mg['g1'], mg['be1'], mg['W2'], mg['b2'], mg['lg'], mg['lb'])
    kernel = _make_layer_kernel(4, B, T, Di, S, dconv)   # 4 passes of the SAME SpatialConv
    out_shape = jax.ShapeDtypeStruct(x.shape, jnp.float32)
    return pl.pallas_call(
        kernel,
        grid=(1,),
        in_specs=[_fullspec(a.shape) for a in args],
        out_specs=_fullspec(x.shape),
        out_shape=out_shape,
        compiler_params=_cparams(("arbitrary",)),
    )(*args)


# ----------------------------- full forward (glue) ----------------------------
def gamba_sp_forward(params, x, edge_index, edge_attr, batch, num_graphs):
    N = x.shape[0]
    src = edge_index[0]
    dst = edge_index[1]
    dst_oh = jax.nn.one_hot(dst, N, dtype=jnp.float32)     # (E, N): gathers x_i (targets)
    src_oh = jax.nn.one_hot(src, N, dtype=jnp.float32)     # (E, N): gathers x_j (sources)
    dst_oh_T = dst_oh.T                                    # (N, E): scatter-add to targets
    sob = edge_attr[:, 0:1]
    bnd = edge_attr[:, 1:2]
    pool_oh_T = jax.nn.one_hot(batch, num_graphs, dtype=jnp.float32)   # (N, B)
    pool_oh = pool_oh_T.T                                              # (B, N)

    x = enc_apply(params['enc'], x)                        # encoder MLP (Pallas)

    for lp in params['layers']:
        # One fused kernel per layer: 4x SpatialConv + Mamba branch + merge + residual LN.
        x = layer_apply(lp, x, dst_oh, src_oh, dst_oh_T, pool_oh_T, sob, bnd)

    return readout_dec_apply(params['dec'], pool_oh, x)    # add-pool + decoder MLP (Pallas)


# ----------------------------- deterministic init -----------------------------
def _linear(key, din, dout, scale=0.1, bias=True):
    kw, kb = jax.random.split(key)
    W = (scale * jax.random.normal(kw, (din, dout))).astype(jnp.float32)
    if not bias:
        return W
    b = (scale * jax.random.normal(kb, (1, dout))).astype(jnp.float32)
    return W, b


def _ln_init(dim):
    return jnp.ones((1, dim), jnp.float32), jnp.zeros((1, dim), jnp.float32)


def init_mlp2(key, din, dh, dout):
    k1, k2, k3 = jax.random.split(key, 3)
    W1, b1 = _linear(k1, din, dh)
    g1, be1 = _ln_init(dh)
    W2, b2 = _linear(k2, dh, dh)
    g2, be2 = _ln_init(dh)
    W3, b3 = _linear(k3, dh, dout)
    return dict(W1=W1, b1=b1, g1=g1, be1=be1, W2=W2, b2=b2, g2=g2, be2=be2, W3=W3, b3=b3)


def init_layer(key, H, T, d_state, d_conv, expand):
    Di = expand * H
    dt_rank = math.ceil(H / 16)
    ks = jax.random.split(key, 18)
    # SpatialConv (PascalVOC-SP branch: node_mlp input = 2H, weights stacked as (2H, H))
    W1a, _ = _linear(ks[0], H, H)
    W1b, b1 = _linear(ks[1], H, H)
    W1 = jnp.concatenate([W1a, W1b], axis=0)               # multiplies [x_i | x_j]
    g1, be1 = _ln_init(H)
    W2, b2 = _linear(ks[2], H, H)
    Wsob, bsob = _linear(ks[3], 1, H)
    Wbnd, bbnd = _linear(ks[4], 1, H)
    fng, fnb = _ln_init(H)
    sc = dict(W1=W1, b1=b1, g1=g1, be1=be1, W2=W2, b2=b2,
              Wsob=Wsob, bsob=bsob, Wbnd=Wbnd, bbnd=bbnd, fng=fng, fnb=fnb)
    # theta (Linear H->T, no bias) + Mamba(d_model=H, d_state, d_conv, expand)
    Wth = _linear(ks[5], H, T, bias=False)
    WinX = _linear(ks[6], H, Di, bias=False)
    WinZ = _linear(ks[7], H, Di, bias=False)
    convw = (0.1 * jax.random.normal(ks[8], (d_conv, Di))).astype(jnp.float32)
    convb = (0.1 * jax.random.normal(ks[9], (1, Di))).astype(jnp.float32)
    Wxdt = _linear(ks[10], Di, dt_rank, bias=False)
    WxB = _linear(ks[11], Di, d_state, bias=False)
    WxC = _linear(ks[12], Di, d_state, bias=False)
    Wdt, bdt = _linear(ks[13], dt_rank, Di)
    Wdt_f = jnp.dot(Wxdt, Wdt).astype(jnp.float32)          # pre-fused (Di, Di), dt_rank tiny
    Alog = (jnp.log(jnp.arange(1, d_state + 1, dtype=jnp.float32))[None, :]
            + jnp.zeros((Di, d_state), jnp.float32))        # standard S4D-real init
    Aneg = (-jnp.exp(Alog)).astype(jnp.float32)             # pure param transform, precomputed
    Dp = jnp.ones((1, Di), jnp.float32)
    Wout = _linear(ks[14], Di, H, bias=False)
    # merge MLP (mlp_depth=1, input 2H, weights stacked as (2H, H)) + post layer norm
    Wa, _ = _linear(ks[15], H, H)
    Wb, mb1 = _linear(ks[16], H, H)
    Wm = jnp.concatenate([Wa, Wb], axis=0)                  # multiplies [pe | x_m]
    mg1, mbe1 = _ln_init(H)
    mW2, mb2 = _linear(ks[17], H, H)
    lg, lb = _ln_init(H)
    merge = dict(W1=Wm, b1=mb1, g1=mg1, be1=mbe1, W2=mW2, b2=mb2, lg=lg, lb=lb)
    return dict(sc=sc, Wth=Wth, WinX=WinX, WinZ=WinZ, convw=convw, convb=convb,
                Wdt_f=Wdt_f, bdt=bdt, WxB=WxB, WxC=WxC, Aneg=Aneg, Dp=Dp,
                Wout=Wout, merge=merge)


def init_params(key, in_channels, hidden, out_channels, layers, T, d_state, d_conv, expand):
    keys = jax.random.split(key, layers + 2)
    return dict(
        hidden=hidden,
        enc=init_mlp2(keys[0], in_channels, hidden, hidden),
        layers=[init_layer(keys[1 + i], hidden, T, d_state, d_conv, expand)
                for i in range(layers)],
        dec=init_mlp2(keys[-1], hidden, hidden, out_channels),
    )


# ----------------------------------- main -------------------------------------
if __name__ == "__main__":
    in_channels, hidden, out_channels = 14, 32, 8
    num_layers = 2
    num_virtual_tokens = 4
    d_state, d_conv, expand = 128, 4, 2

    nodes_per_graph = [6, 10]
    num_graphs = len(nodes_per_graph)
    N = sum(nodes_per_graph)

    # deterministic bidirectional ring graph per component
    edges = []
    off = 0
    for n_g in nodes_per_graph:
        for i in range(n_g):
            a, b = off + i, off + (i + 1) % n_g
            edges.append((a, b))
            edges.append((b, a))
        off += n_g
    edge_index = jnp.asarray(np.array(edges, dtype=np.int32).T)   # (2, E)
    batch = jnp.asarray(np.repeat(np.arange(num_graphs), nodes_per_graph).astype(np.int32))

    key = jax.random.PRNGKey(0)
    kx, ke, kp = jax.random.split(key, 3)
    x = jax.random.normal(kx, (N, in_channels), jnp.float32)
    edge_attr = jax.random.uniform(ke, (edge_index.shape[1], 2), dtype=jnp.float32)

    params = init_params(kp, in_channels, hidden, out_channels, num_layers,
                         num_virtual_tokens, d_state, d_conv, expand)

    out = gamba_sp_forward(params, x, edge_index, edge_attr, batch, num_graphs)
    out = jax.block_until_ready(out)
    assert out.shape == (num_graphs, out_channels), out.shape
    assert bool(jnp.all(jnp.isfinite(out)))
    print("KERNEL_OK")
</pallas_src>

<mosaic_0001>
module attributes {stable_mosaic.version = 11 : i64} {
  func.func @_mlp2_kernel(%arg0: i32, %arg1: memref<16x14xf32, #tpu.memory_space<vmem>>, %arg2: memref<14x32xf32, #tpu.memory_space<vmem>>, %arg3: memref<1x32xf32, #tpu.memory_space<vmem>>, %arg4: memref<1x32xf32, #tpu.memory_space<vmem>>, %arg5: memref<1x32xf32, #tpu.memory_space<vmem>>, %arg6: memref<32x32xf32, #tpu.memory_space<vmem>>, %arg7: memref<1x32xf32, #tpu.memory_space<vmem>>, %arg8: memref<1x32xf32, #tpu.memory_space<vmem>>, %arg9: memref<1x32xf32, #tpu.memory_space<vmem>>, %arg10: memref<32x32xf32, #tpu.memory_space<vmem>>, %arg11: memref<1x32xf32, #tpu.memory_space<vmem>>, %arg12: memref<16x32xf32, #tpu.memory_space<vmem>>) attributes {dimension_semantics = [#tpu.dimension_semantics<arbitrary>], iteration_bounds = array<i64: 1>, scalar_prefetch = 0 : i64, scratch_operands = 0 : i64, tpu.core_type = #tpu.core_type<tc>, window_params = [{pipeline_mode = #tpu.pipeline_mode<synchronous>, transform_indices = @transform_0, window_bounds = array<i64: 16, 14>}, {pipeline_mode = #tpu.pipeline_mode<synchronous>, transform_indices = @transform_1, window_bounds = array<i64: 14, 32>}, {pipeline_mode = #tpu.pipeline_mode<synchronous>, transform_indices = @transform_2, window_bounds = array<i64: 1, 32>}, {pipeline_mode = #tpu.pipeline_mode<synchronous>, transform_indices = @transform_3, window_bounds = array<i64: 1, 32>}, {pipeline_mode = #tpu.pipeline_mode<synchronous>, transform_indices = @transform_4, window_bounds = array<i64: 1, 32>}, {pipeline_mode = #tpu.pipeline_mode<synchronous>, transform_indices = @transform_5, window_bounds = array<i64: 32, 32>}, {pipeline_mode = #tpu.pipeline_mode<synchronous>, transform_indices = @transform_6, window_bounds = array<i64: 1, 32>}, {pipeline_mode = #tpu.pipeline_mode<synchronous>, transform_indices = @transform_7, window_bounds = array<i64: 1, 32>}, {pipeline_mode = #tpu.pipeline_mode<synchronous>, transform_indices = @transform_8, window_bounds = array<i64: 1, 32>}, {pipeline_mode = #tpu.pipeline_mode<synchronous>, transform_indices = @transform_9, window_bounds = array<i64: 32, 32>}, {pipeline_mode = #tpu.pipeline_mode<synchronous>, transform_indices = @transform_10, window_bounds = array<i64: 1, 32>}, {pipeline_mode = #tpu.pipeline_mode<synchronous>, transform_indices = @transform_11, window_bounds = array<i64: 16, 32>}]} {
    %c0 = arith.constant 0 : index
    %c0_0 = arith.constant 0 : index
    %0 = vector.load %arg1[%c0, %c0_0] : memref<16x14xf32, #tpu.memory_space<vmem>>, vector<16x14xf32>
    %c0_1 = arith.constant 0 : index
    %c0_2 = arith.constant 0 : index
    %1 = vector.load %arg2[%c0_1, %c0_2] : memref<14x32xf32, #tpu.memory_space<vmem>>, vector<14x32xf32>
    %cst = arith.constant dense<0.000000e+00> : vector<16x32xf32>
    %2 = tpu.matmul %0, %1, %cst {dimension_numbers = #tpu.dot_dimension_numbers<[1], [0], [0], [1], [0, 0, 1, 1], [], []>} : vector<16x14xf32>, vector<14x32xf32>, vector<16x32xf32> -> vector<16x32xf32>
    %c0_3 = arith.constant 0 : index
    %c0_4 = arith.constant 0 : index
    %3 = vector.load %arg3[%c0_3, %c0_4] : memref<1x32xf32, #tpu.memory_space<vmem>>, vector<1x32xf32>
    %4 = vector.broadcast %3 : vector<1x32xf32> to vector<16x32xf32>
    %5 = arith.addf %2, %4 : vector<16x32xf32>
    %c0_5 = arith.constant 0 : index
    %c0_6 = arith.constant 0 : index
    %6 = vector.load %arg4[%c0_5, %c0_6] : memref<1x32xf32, #tpu.memory_space<vmem>>, vector<1x32xf32>
    %c0_7 = arith.constant 0 : index
    %c0_8 = arith.constant 0 : index
    %7 = vector.load %arg5[%c0_7, %c0_8] : memref<1x32xf32, #tpu.memory_space<vmem>>, vector<1x32xf32>
    %cst_9 = arith.constant dense<0.000000e+00> : vector<16xf32>
    %8 = vector.multi_reduction <add>, %5, %cst_9 [1] : vector<16x32xf32> to vector<16xf32>
    %9 = vector.shape_cast %8 : vector<16xf32> to vector<16x1xf32>
    %cst_10 = arith.constant 3.200000e+01 : f32
    %10 = vector.broadcast %cst_10 : f32 to vector<16x1xf32>
    %11 = arith.divf %9, %10 : vector<16x1xf32>
    %12 = vector.broadcast %11 : vector<16x1xf32> to vector<16x32xf32>
    %13 = arith.subf %5, %12 : vector<16x32xf32>
    %14 = arith.mulf %13, %13 : vector<16x32xf32>
    %cst_11 = arith.constant dense<0.000000e+00> : vector<16xf32>
    %15 = vector.multi_reduction <add>, %14, %cst_11 [1] : vector<16x32xf32> to vector<16xf32>
    %16 = vector.shape_cast %15 : vector<16xf32> to vector<16x1xf32>
    %cst_12 = arith.constant 3.200000e+01 : f32
    %17 = vector.broadcast %cst_12 : f32 to vector<16x1xf32>
    %18 = arith.divf %16, %17 : vector<16x1xf32>
    %19 = vector.broadcast %11 : vector<16x1xf32> to vector<16x32xf32>
    %20 = arith.subf %5, %19 : vector<16x32xf32>
    %cst_13 = arith.constant 9.99999974E-6 : f32
    %21 = vector.broadcast %cst_13 : f32 to vector<16x1xf32>
    %22 = arith.addf %18, %21 : vector<16x1xf32>
    %23 = math.rsqrt %22 : vector<16x1xf32>
    %24 = vector.broadcast %23 : vector<16x1xf32> to vector<16x32xf32>
    %25 = arith.mulf %20, %24 : vector<16x32xf32>
    %26 = vector.broadcast %6 : vector<1x32xf32> to vector<16x32xf32>
    %27 = arith.mulf %25, %26 : vector<16x32xf32>
    %28 = vector.broadcast %7 : vector<1x32xf32> to vector<16x32xf32>
    %29 = arith.addf %27, %28 : vector<16x32xf32>
    %cst_14 = arith.constant 0.000000e+00 : f32
    %30 = vector.broadcast %cst_14 : f32 to vector<16x32xf32>
    %31 = arith.maximumf %29, %30 : vector<16x32xf32>
    %c0_15 = arith.constant 0 : index
    %c0_16 = arith.constant 0 : index
    %32 = vector.load %arg6[%c0_15, %c0_16] : memref<32x32xf32, #tpu.memory_space<vmem>>, vector<32x32xf32>
    %cst_17 = arith.constant dense<0.000000e+00> : vector<16x32xf32>
    %33 = tpu.matmul %31, %32, %cst_17 {dimension_numbers = #tpu.dot_dimension_numbers<[1], [0], [0], [1], [0, 0, 1, 1], [], []>} : vector<16x32xf32>, vector<32x32xf32>, vector<16x32xf32> -> vector<16x32xf32>
    %c0_18 = arith.constant 0 : index
    %c0_19 = arith.constant 0 : index
    %34 = vector.load %arg7[%c0_18, %c0_19] : memref<1x32xf32, #tpu.memory_space<vmem>>, vector<1x32xf32>
    %35 = vector.broadcast %34 : vector<1x32xf32> to vector<16x32xf32>
    %36 = arith.addf %33, %35 : vector<16x32xf32>
    %c0_20 = arith.constant 0 : index
    %c0_21 = arith.constant 0 : index
    %37 = vector.load %arg8[%c0_20, %c0_21] : memref<1x32xf32, #tpu.memory_space<vmem>>, vector<1x32xf32>
    %c0_22 = arith.constant 0 : index
    %c0_23 = arith.constant 0 : index
    %38 = vector.load %arg9[%c0_22, %c0_23] : memref<1x32xf32, #tpu.memory_space<vmem>>, vector<1x32xf32>
    %cst_24 = arith.constant dense<0.000000e+00> : vector<16xf32>
    %39 = vector.multi_reduction <add>, %36, %cst_24 [1] : vector<16x32xf32> to vector<16xf32>
    %40 = vector.shape_cast %39 : vector<16xf32> to vector<16x1xf32>
    %cst_25 = arith.constant 3.200000e+01 : f32
    %41 = vector.broadcast %cst_25 : f32 to vector<16x1xf32>
    %42 = arith.divf %40, %41 : vector<16x1xf32>
    %43 = vector.broadcast %42 : vector<16x1xf32> to vector<16x32xf32>
    %44 = arith.subf %36, %43 : vector<16x32xf32>
    %45 = arith.mulf %44, %44 : vector<16x32xf32>
    %cst_26 = arith.constant dense<0.000000e+00> : vector<16xf32>
    %46 = vector.multi_reduction <add>, %45, %cst_26 [1] : vector<16x32xf32> to vector<16xf32>
    %47 = vector.shape_cast %46 : vector<16xf32> to vector<16x1xf32>
    %cst_27 = arith.constant 3.200000e+01 : f32
    %48 = vector.broadcast %cst_27 : f32 to vector<16x1xf32>
    %49 = arith.divf %47, %48 : vector<16x1xf32>
    %50 = vector.broadcast %42 : vector<16x1xf32> to vector<16x32xf32>
    %51 = arith.subf %36, %50 : vector<16x32xf32>
    %cst_28 = arith.constant 9.99999974E-6 : f32
    %52 = vector.broadcast %cst_28 : f32 to vector<16x1xf32>
    %53 = arith.addf %49, %52 : vector<16x1xf32>
    %54 = math.rsqrt %53 : vector<16x1xf32>
    %55 = vector.broadcast %54 : vector<16x1xf32> to vector<16x32xf32>
    %56 = arith.mulf %51, %55 : vector<16x32xf32>
    %57 = vector.broadcast %37 : vector<1x32xf32> to vector<16x32xf32>
    %58 = arith.mulf %56, %57 : vector<16x32xf32>
    %59 = vector.broadcast %38 : vector<1x32xf32> to vector<16x32xf32>
    %60 = arith.addf %58, %59 : vector<16x32xf32>
    %cst_29 = arith.constant 0.000000e+00 : f32
    %61 = vector.broadcast %cst_29 : f32 to vector<16x32xf32>
    %62 = arith.maximumf %60, %61 : vector<16x32xf32>
    %c0_30 = arith.constant 0 : index
    %c0_31 = arith.constant 0 : index
    %63 = vector.load %arg10[%c0_30, %c0_31] : memref<32x32xf32, #tpu.memory_space<vmem>>, vector<32x32xf32>
    %cst_32 = arith.constant dense<0.000000e+00> : vector<16x32xf32>
    %64 = tpu.matmul %62, %63, %cst_32 {dimension_numbers = #tpu.dot_dimension_numbers<[1], [0], [0], [1], [0, 0, 1, 1], [], []>} : vector<16x32xf32>, vector<32x32xf32>, vector<16x32xf32> -> vector<16x32xf32>
    %c0_33 = arith.constant 0 : index
    %c0_34 = arith.constant 0 : index
    %65 = vector.load %arg11[%c0_33, %c0_34] : memref<1x32xf32, #tpu.memory_space<vmem>>, vector<1x32xf32>
    %66 = vector.broadcast %65 : vector<1x32xf32> to vector<16x32xf32>
    %67 = arith.addf %64, %66 : vector<16x32xf32>
    %c0_35 = arith.constant 0 : index
    %c0_36 = arith.constant 0 : index
    %68 = vector.load %arg12[%c0_35, %c0_36] : memref<16x32xf32, #tpu.memory_space<vmem>>, vector<16x32xf32>
    tpu.vector_store %arg12[%c0_35, %c0_36], %67 {strides = array<i32>} : memref<16x32xf32, #tpu.memory_space<vmem>>, vector<16x32xf32>,
    return
  }
  func.func @transform_0(%arg0: i32) -> (i32, i32) {
    %c0_i32 = arith.constant 0 : i32
    %c0_i32_0 = arith.constant 0 : i32
    %c0_i32_1 = arith.constant 0 : i32
    return %c0_i32, %c0_i32_0 : i32, i32
  }
  func.func @transform_1(%arg0: i32) -> (i32, i32) {
    %c0_i32 = arith.constant 0 : i32
    %c0_i32_0 = arith.constant 0 : i32
    %c0_i32_1 = arith.constant 0 : i32
    return %c0_i32, %c0_i32_0 : i32, i32
  }
  func.func @transform_2(%arg0: i32) -> (i32, i32) {
    %c0_i32 = arith.constant 0 : i32
    %c0_i32_0 = arith.constant 0 : i32
    %c0_i32_1 = arith.constant 0 : i32
    return %c0_i32, %c0_i32_0 : i32, i32
  }
  func.func @transform_3(%arg0: i32) -> (i32, i32) {
    %c0_i32 = arith.constant 0 : i32
    %c0_i32_0 = arith.constant 0 : i32
    %c0_i32_1 = arith.constant 0 : i32
    return %c0_i32, %c0_i32_0 : i32, i32
  }
  func.func @transform_4(%arg0: i32) -> (i32, i32) {
    %c0_i32 = arith.constant 0 : i32
    %c0_i32_0 = arith.constant 0 : i32
    %c0_i32_1 = arith.constant 0 : i32
    return %c0_i32, %c0_i32_0 : i32, i32
  }
  func.func @transform_5(%arg0: i32) -> (i32, i32) {
    %c0_i32 = arith.constant 0 : i32
    %c0_i32_0 = arith.constant 0 : i32
    %c0_i32_1 = arith.constant 0 : i32
    return %c0_i32, %c0_i32_0 : i32, i32
  }
  func.func @transform_6(%arg0: i32) -> (i32, i32) {
    %c0_i32 = arith.constant 0 : i32
    %c0_i32_0 = arith.constant 0 : i32
    %c0_i32_1 = arith.constant 0 : i32
    return %c0_i32, %c0_i32_0 : i32, i32
  }
  func.func @transform_7(%arg0: i32) -> (i32, i32) {
    %c0_i32 = arith.constant 0 : i32
    %c0_i32_0 = arith.constant 0 : i32
    %c0_i32_1 = arith.constant 0 : i32
    return %c0_i32, %c0_i32_0 : i32, i32
  }
  func.func @transform_8(%arg0: i32) -> (i32, i32) {
    %c0_i32 = arith.constant 0 : i32
    %c0_i32_0 = arith.constant 0 : i32
    %c0_i32_1 = arith.constant 0 : i32
    return %c0_i32, %c0_i32_0 : i32, i32
  }
  func.func @transform_9(%arg0: i32) -> (i32, i32) {
    %c0_i32 = arith.constant 0 : i32
    %c0_i32_0 = arith.constant 0 : i32
    %c0_i32_1 = arith.constant 0 : i32
    return %c0_i32, %c0_i32_0 : i32, i32
  }
  func.func @transform_10(%arg0: i32) -> (i32, i32) {
    %c0_i32 = arith.constant 0 : i32
    %c0_i32_0 = arith.constant 0 : i32
    %c0_i32_1 = arith.constant 0 : i32
    return %c0_i32, %c0_i32_0 : i32, i32
  }
  func.func @transform_11(%arg0: i32) -> (i32, i32) {
    %c0_i32 = arith.constant 0 : i32
    %c0_i32_0 = arith.constant 0 : i32
    %c0_i32_1 = arith.constant 0 : i32
    return %c0_i32, %c0_i32_0 : i32, i32
  }
}

</mosaic_0001>

<bundles_post_ra>
// kernel: tpu_custom_call.1
= control target key start
LH: loop header
LB: loop body
LE: loop exit
PB: predicated region body
PF: predicated region fallthrough
CT: control target
= control target key end

     0   :  { %16 = vsyncpa [#allocation3], 0  ;;  %s1037_s0 = inlined_call_operand.hbm [shape: f32[16,14], index: 0, kind: input, shape index: {}]   ;;  %s1038_s1 = inlined_call_operand.hbm [shape: f32[14,32], index: 1, kind: input, shape index: {}]   ;;  %s1039_s2 = inlined_call_operand.vmem [shape: f32[1,32], index: 2, kind: input, shape index: {}]   ;;  %s1040_s3 = inlined_call_operand.vmem [shape: f32[1,32], index: 3, kind: input, shape index: {}]   ;;  %s1041_s4 = inlined_call_operand.hbm [shape: f32[1,32], index: 4, kind: input, shape index: {}]   ;;  %s1042_s5 = inlined_call_operand.hbm [shape: f32[32,32], index: 5, kind: input, shape index: {}]   ;;  %s1043_s6 = inlined_call_operand.hbm [shape: f32[1,32], index: 6, kind: input, shape index: {}]   ;;  %s1044_s7 = inlined_call_operand.hbm [shape: f32[1,32], index: 7, kind: input, shape index: {}]   ;;  %s1045_s8 = inlined_call_operand.hbm [shape: f32[1,32], index: 8, kind: input, shape index: {}]   ;;  %s1046_s9 = inlined_call_operand.vmem [shape: f32[32,32], index: 9, kind: input, shape index: {}]   ;;  %s1047_s10 = inlined_call_operand.vmem [shape: f32[1,32], index: 10, kind: input, shape index: {}]   ;;  %s1048_s11 = inlined_call_operand.hbm [shape: f32[16,32], index: 11, kind: output, shape index: {}]  }
   0x1   :  { %17 = vsyncpa [#allocation6], 0 }
   0x2   :  { %18 = vsyncpa [#allocation9], 0 }
   0x3   :  { %19 = vsyncpa [#allocation12], 0 }
   0x4   :  { %20 = vsyncpa [#allocation4], 0  ;;  %s809_s17 = smov [#allocation5]   ;;  %s810_s19 = smov [#allocation8]  }
   0x5   :  { %s38_s18 = sshll.u32 %s809_s17, 4  ;;  %s64_s20 = sshll.u32 %s810_s19, 4  ;;  %s39_s18 = int_to_ptr.vmem [resolvable:$true] %s38_s18  ;;  %s880_s20 = int_to_ptr.vmem [resolvable:$true] %s64_s20 }
   0x6   :  { %s623_s23 = scalar_lea.hbm %s1038_s1, 256 }
   0x7   :  { %p624_p0 = scmp.ne.s32.totalorder %s1038_s1, %s623_s23  ;;  %p627_p1 = scmp.lt.u32.totalorder %s623_s23, %s1038_s1 }
   0x9   :  { %p629_p2 = pnand %p627_p1, %p624_p0 }
   0xb   :  { %632 = shalt.err (!%p629_p2)
}
   0xc   :  { %s633_s28 = scalar_lea.vmem %s39_s18, 256  ;;  %p638_p4 = scmp.lt.s32.totalorder %s39_s18, %s39_s18 }
   0xd   :  { %p634_p3 = scmp.ne.s32.totalorder %s39_s18, %s633_s28  ;;  %p639_p5 = scmp.lt.s32.totalorder %s633_s28, %s633_s28 }
   0xf   :  { %p640_p6 = por %p639_p5, %p638_p4 }
  0x11   :  { %p641_p7 = pnand %p640_p6, %p634_p3 }
  0x13   :  { %644 = shalt.err (!%p641_p7)
}
  0x14   :  { %s811_s29 = smov 128   ;;  %s812_s30 = smov 8  }
  0x15   :  { %44 = dma.hbm_to_vmem [thread:$0]  %s1038_s1, 256, %s39_s18, [#allocation6], %s811_s29, %s811_s29, %s812_s30  }
  0x16   :  { %s645_s16 = scalar_lea.hbm %s1042_s5, 512 }
  0x17   :  { %p646_p8 = scmp.ne.s32.totalorder %s1042_s5, %s645_s16  ;;  %p649_p9 = scmp.lt.u32.totalorder %s645_s16, %s1042_s5 }
  0x19   :  { %p651_p10 = pnand %p649_p9, %p646_p8 }
  0x1b   :  { %654 = shalt.err (!%p651_p10)
}
  0x1c   :  { %s655_s23 = scalar_lea.vmem %s880_s20, 512  ;;  %p660_p12 = scmp.lt.s32.totalorder %s880_s20, %s880_s20 }
  0x1d   :  { %p656_p11 = scmp.ne.s32.totalorder %s880_s20, %s655_s23  ;;  %p661_p13 = scmp.lt.s32.totalorder %s655_s23, %s655_s23 }
  0x1f   :  { %p662_p0 = por %p661_p13, %p660_p12 }
  0x21   :  { %p663_p1 = pnand %p662_p0, %p656_p11 }
  0x23   :  { %666 = shalt.err (!%p663_p1)
}
  0x24   :  { %70 = dma.hbm_to_vmem [thread:$0]  %s1042_s5, 512, %s880_s20, [#allocation9], %s811_s29, %s811_s29, %s812_s30  }
  0x25   :  { %s813_s24 = smov [#allocation11]   ;;  %s814_s26 = smov [#allocation2]  }
  0x26   :  { %s87_s25 = sshll.u32 %s813_s24, 4  ;;  %s26_s27 = sshll.u32 %s814_s26, 4  ;;  %s88_s25 = int_to_ptr.vmem [resolvable:$true] %s87_s25  ;;  %s917_s27 = int_to_ptr.vmem [resolvable:$true] %s26_s27 }
  0x27   :  { %s667_s13 = scalar_lea.hbm %s1044_s7, 16 }
  0x28   :  { %p668_p2 = scmp.ne.s32.totalorder %s1044_s7, %s667_s13  ;;  %p671_p3 = scmp.lt.u32.totalorder %s667_s13, %s1044_s7 }
  0x2a   :  { %p673_p4 = pnand %p671_p3, %p668_p2 }
  0x2c   :  { %676 = shalt.err (!%p673_p4)
}
  0x2d   :  { %s677_s5 = scalar_lea.vmem %s88_s25, 16  ;;  %s681_s20 = scalar_lea.vmem %s88_s25, 32 }
  0x2e   :  { %p678_p5 = scmp.ne.s32.totalorder %s88_s25, %s677_s5  ;;  %p682_p6 = scmp.lt.s32.totalorder %s88_s25, %s88_s25 }
  0x2f   :  { %p683_p7 = scmp.lt.s32.totalorder %s681_s20, %s677_s5 }
  0x31   :  { %p684_p8 = por %p683_p7, %p682_p6 }
  0x33   :  { %p685_p9 = pnand %p684_p8, %p678_p5 }
  0x35   :  { %688 = shalt.err (!%p685_p9)
}
  0x36   :  { %90 = dma.hbm_to_vmem [thread:$0]  %s1044_s7, 16, %s88_s25, [#allocation12]  }
  0x37   :  { %s689_s1 = scalar_lea.hbm %s1037_s0, 256 }
  0x38   :  { %p690_p10 = scmp.ne.s32.totalorder %s1037_s0, %s689_s1  ;;  %p693_p11 = scmp.lt.u32.totalorder %s689_s1, %s1037_s0 }
  0x3a   :  { %p695_p12 = pnand %p693_p11, %p690_p10 }
  0x3c   :  { %698 = shalt.err (!%p695_p12)
}
  0x3d   :  { %s699_s12 = scalar_lea.vmem %s917_s27, 256  ;;  %p704_p0 = scmp.lt.s32.totalorder %s917_s27, %s917_s27 }
  0x3e   :  { %p700_p13 = scmp.ne.s32.totalorder %s917_s27, %s699_s12  ;;  %p705_p1 = scmp.lt.s32.totalorder %s699_s12, %s699_s12 }
  0x40   :  { %p706_p2 = por %p705_p1, %p704_p0 }
  0x42   :  { %p707_p3 = pnand %p706_p2, %p700_p13 }
  0x44   :  { %710 = shalt.err (!%p707_p3)
}
  0x45   :  { %32 = dma.hbm_to_vmem [thread:$0]  %s1037_s0, 256, %s917_s27, [#allocation3], %s811_s29, %s811_s29, %s812_s30  }
  0x46   :  { %s815_s13 = smov [#allocation7]   ;;  %s816_s15 = smov [#allocation10]  }
  0x47   :  { %s55_s14 = sshll.u32 %s815_s13, 4  ;;  %s77_s16 = sshll.u32 %s816_s15, 4  ;;  %s56_s14 = int_to_ptr.vmem [resolvable:$true] %s55_s14  ;;  %s78_s16 = int_to_ptr.vmem [resolvable:$true] %s77_s16 }
  0x48   :  { %s711_s20 = scalar_lea.hbm %s1041_s4, 16 }
  0x49   :  { %p712_p4 = scmp.ne.s32.totalorder %s1041_s4, %s711_s20  ;;  %p715_p5 = scmp.lt.u32.totalorder %s711_s20, %s1041_s4 }
  0x4b   :  { %p717_p6 = pnand %p715_p5, %p712_p4 }
  0x4d   :  { %720 = shalt.err (!%p717_p6)
}
  0x4e   :  { %s721_s0 = scalar_lea.vmem %s56_s14, 16  ;;  %s725_s27 = scalar_lea.vmem %s56_s14, 32 }
  0x4f   :  { %p722_p7 = scmp.ne.s32.totalorder %s56_s14, %s721_s0  ;;  %p726_p8 = scmp.lt.s32.totalorder %s56_s14, %s56_s14 }
  0x50   :  { %p727_p9 = scmp.lt.s32.totalorder %s725_s27, %s721_s0 }
  0x52   :  { %p728_p10 = por %p727_p9, %p726_p8 }
  0x54   :  { %p729_p11 = pnand %p728_p10, %p722_p7 }
  0x56   :  { %732 = shalt.err (!%p729_p11)
}
  0x57   :  { %58 = dma.hbm_to_vmem [thread:$0]  %s1041_s4, 16, %s56_s14, [#allocation6]  }
  0x58   :  { %s733_s28 = scalar_lea.hbm %s1043_s6, 16 }
  0x59   :  { %p734_p12 = scmp.ne.s32.totalorder %s1043_s6, %s733_s28  ;;  %p737_p13 = scmp.lt.u32.totalorder %s733_s28, %s1043_s6 }
  0x5b   :  { %p739_p0 = pnand %p737_p13, %p734_p12 }
  0x5d   :  { %742 = shalt.err (!%p739_p0)
}
  0x5e   :  { %s743_s15 = scalar_lea.vmem %s78_s16, 16  ;;  %s747_s17 = scalar_lea.vmem %s78_s16, 32 }
  0x5f   :  { %p744_p1 = scmp.ne.s32.totalorder %s78_s16, %s743_s15  ;;  %p748_p2 = scmp.lt.s32.totalorder %s78_s16, %s78_s16 }
  0x60   :  { %p749_p3 = scmp.lt.s32.totalorder %s747_s17, %s743_s15 }
  0x62   :  { %p750_p4 = por %p749_p3, %p748_p2 }
  0x64   :  { %p751_p5 = pnand %p750_p4, %p744_p1 }
  0x66   :  { %754 = shalt.err (!%p751_p5)
}
  0x67   :  { %80 = dma.hbm_to_vmem [thread:$0]  %s1043_s6, 16, %s78_s16, [#allocation9]  }
  0x68   :  { %s817_s5 = smov [#allocation13]   ;;  %s755_s22 = scalar_lea.hbm %s1045_s8, 16 }
  0x69   :  { %s97_s20 = sshll.u32 %s817_s5, 4  ;;  %p756_p6 = scmp.ne.s32.totalorder %s1045_s8, %s755_s22  ;;  %s98_s20 = int_to_ptr.vmem [resolvable:$true] %s97_s20 }
  0x6a   :  { %p759_p7 = scmp.lt.u32.totalorder %s755_s22, %s1045_s8 }
  0x6c   :  { %p761_p8 = pnand %p759_p7, %p756_p6 }
  0x6e   :  { %764 = shalt.err (!%p761_p8)
}
  0x6f   :  { %s765_s18 = scalar_lea.vmem %s98_s20, 16  ;;  %s769_s6 = scalar_lea.vmem %s98_s20, 32 }
  0x70   :  { %p766_p9 = scmp.ne.s32.totalorder %s98_s20, %s765_s18  ;;  %p770_p10 = scmp.lt.s32.totalorder %s98_s20, %s98_s20 }
  0x71   :  { %p771_p11 = scmp.lt.s32.totalorder %s769_s6, %s765_s18 }
  0x73   :  { %p772_p12 = por %p771_p11, %p770_p10 }
  0x75   :  { %p773_p13 = pnand %p772_p12, %p766_p9 }
  0x77   :  { %776 = shalt.err (!%p773_p13)
}
  0x78   :  { %100 = dma.hbm_to_vmem [thread:$0]  %s1045_s8, 16, %s98_s20, [#allocation12]  }
  0x79   :  { %799 = dma.done.wait [#allocation3], 256  }
  0x7a   :  { %800 = vsyncadd [#allocation3], 4294967040 }
  0x7b   :  { %801 = dma.done.wait [#allocation6], 272  }
  0x7c   :  { %802 = vsyncadd [#allocation6], 4294967024 }
  0x7d   :  { %803 = dma.done.wait [#allocation9], 528  }
  0x7e   :  { %804 = vsyncadd [#allocation9], 4294966768 }
  0x7f   :  { %805 = dma.done.wait [#allocation12], 32  }
  0x80   :  { %806 = vsyncadd [#allocation12], 4294967264  ;;  %vm144_vm0 = vcmask 1045504   ;;  %vm137_vm1 = vcmask 113664   ;;  %vm818_vm2 = vmmov 1   ;;  %v128_v0 = vld [vmem:[#allocation5] sm:$0xff] }
  0x81   :  { %vm583_vm3 = vmpackc.low %vm144_vm0, %vm818_vm2  ;;  %v129_v1 = vld [vmem:[#allocation5 + $0x8] sm:$0x3f]  ;;  %v126_v2 = vld [vmem:[#allocation2] sm:$0xff]  ;;  %vm225_vm4 = vcmask 261120   ;;  %s819_s5 = smov [#allocation14]  }
  0x82   :  { %v582_v3 = vpack.c.bf16 %v129_v1, %v128_v0  ;;  %557 = vmatprep.mubr.msk.f32.mxu0 %vm137_vm1, %v126_v2  ;;  %v127_v4 = vld [vmem:[#allocation2 + $0x8] sm:$0xff]  ;;  %v523_v5 = vld [vmem:[%s1039_s2] ss:$0 sm:$0xff]  ;;  %v273_v24 = vld [vmem:[#allocation8 + $0x10] sm:$0xff]  ;;  %s508_s20 = sshll.u32 %s819_s5, 4  ;;  %s509_s20 = int_to_ptr.vmem [resolvable:$true] %s508_s20 }
  0x83   :  { %v271_v22 = vld [vmem:[#allocation8] sm:$0xff]  ;;  %v272_v23 = vld [vmem:[#allocation8 + $0x8] sm:$0xff]  ;;  %v274_v26 = vld [vmem:[#allocation8 + $0x18] sm:$0xff]  ;;  %s777_s19 = scalar_lea.vmem %s509_s20, 256  ;;  %p782_p1 = scmp.lt.s32.totalorder %s509_s20, %s509_s20 }
  0x84   :  { %584 = vmatprep.subr.msk.bf16.mxu0 %vm583_vm3, %v582_v3  ;;  %v588_v25 = vpack.c.bf16 %v272_v23, %v271_v22  ;;  %v592_v27 = vpack.c.bf16 %v274_v26, %v273_v24  ;;  %v527_v35 = vld [vmem:[%s1040_s3] ss:$0 sm:$0xff]  ;;  %v529_v46 = vld [vmem:[#allocation10] ss:$0 sm:$0xff]  ;;  %v410_v0 = vld [vmem:[%s1046_s9 + $0x8] sm:$0xff]  ;;  %p778_p0 = scmp.ne.s32.totalorder %s509_s20, %s777_s19  ;;  %p783_p2 = scmp.lt.s32.totalorder %s777_s19, %s777_s19 }
  0x85   :  { %587 = vmatpush3.bf16.msk.msra.mxu0 %vm583_vm3, %v582_v3  ;;  %v528_v37 = vld [vmem:[#allocation7] ss:$0 sm:$0xff]  ;;  %v411_v2 = vld [vmem:[%s1046_s9 + $0x10] sm:$0xff]  ;;  %v412_v3 = vld [vmem:[%s1046_s9 + $0x18] sm:$0xff] }
  0x86   :  { %589 = vmatprep.subr.bf16.mxu1 %v588_v25  ;;  %v409_v63 = vld [vmem:[%s1046_s9] sm:$0xff]  ;;  %p784_p3 = por %p783_p2, %p782_p1 }
  0x87   :  { %591 = vmatpush3.bf16.msra.mxu1 %v588_v25  ;;  %v596_v1 = vpack.c.bf16 %v410_v0, %v409_v63  ;;  %v534_v23 = vld [vmem:[%s1047_s10] ss:$0 sm:$0xff] }
  0x88   :  { %558 = vmatmul.mubr.msk.f32.vlgmr.msra.gmra.mrb[0].mxu0 %vm137_vm1, %v127_v4  ;;  %593 = vmatprep.subr.bf16.mxu1 %v592_v27  ;;  %v600_v4 = vpack.c.bf16 %v412_v3, %v411_v2  ;;  %p785_p4 = pnand %p784_p3, %p778_p0 }
  0x89   :  { %597 = vmatprep.subr.bf16.mxu0 %v596_v1 }
  0x8a   :  { %599 = vmatpush3.bf16.msra.mxu0 %v596_v1 }
  0x8b   :  { %595 = vmatpush3.bf16.msra.mxu1 %v592_v27  ;;  %601 = vmatprep.subr.bf16.mxu0 %v600_v4 }
  0x8e   :  { %603 = vmatpush3.bf16.msra.mxu0 %v600_v4 }
 0x15b   :  { %v559_v6 = vpop.f32.mrb[0].mxu0 }
 0x15c   :  { %v214_v7 = vpop.f32.mrb[1].mxu0  ;;  %v220_v9 = vadd.f32 %v559_v6, %v523_v5 }
 0x15d   :  { %v215_v8 = vadd.f32 %v523_v5, %v214_v7 }
 0x15e   :  { %v229_v11 = vsel %vm225_vm4, %v220_v9, 0.0 }
 0x15f   :  { %v226_v10 = vsel %vm225_vm4, %v215_v8, 0.0 }
 0x160   :  { %227 = vadd.xlane.f32.xlu0 %v226_v10 }
 0x164   :  { %230 = vadd.xlane.f32.xlu0 %v229_v11 }
 0x1ed   :  { %v228_v12 = vpop.xlane.xlu0 %227 }
 0x1ee   :  { %v233_v13 = vmul.f32 0.03125, %v228_v12  ;;  %v532_v12 = vld [vmem:[#allocation11] ss:$0 sm:$0xff] }
 0x1f0   :  { %v235_v14 = vsub.f32 %v215_v8, %v233_v13 }
 0x1f1   :  { %v231_v15 = vpop.xlane.xlu0 %230 }
 0x1f2   :  { %v234_v16 = vmul.f32 0.03125, %v231_v15  ;;  %v237_v17 = vmul.f32 %v235_v14, %v235_v14 }
 0x1f4   :  { %v236_v18 = vsub.f32 %v220_v9, %v234_v16  ;;  %v239_v19 = vsel %vm225_vm4, %v237_v17, 0.0  ;;  %v533_v16 = vld [vmem:[#allocation13] ss:$0 sm:$0xff] }
 0x1f5   :  { %240 = vadd.xlane.f32.xlu1 %v239_v19 }
 0x1f6   :  { %v238_v20 = vmul.f32 %v236_v18, %v236_v18 }
 0x1f8   :  { %v242_v21 = vsel %vm225_vm4, %v238_v20, 0.0 }
 0x1f9   :  { %243 = vadd.xlane.f32.xlu1 %v242_v21 }
 0x282   :  { %v241_v28 = vpop.xlane.xlu1 %240 }
 0x283   :  { %v245_v29 = vmul.f32 0.03125, %v241_v28 }
 0x285   :  { %v247_v30 = vadd.f32 1e-05, %v245_v29 }
 0x286   :  { %v244_v31 = vpop.xlane.xlu1 %243 }
 0x287   :  { %615 = vrsqrt.f32 %v247_v30  ;;  %v246_v32 = vmul.f32 0.03125, %v244_v31 }
 0x289   :  { %v248_v33 = vadd.f32 1e-05, %v246_v32 }
 0x28b   :  { %617 = vrsqrt.f32 %v248_v33 }
 0x291   :  { %v616_v34 = vpop.eup %615 }
 0x292   :  { %v251_v36 = vmul.f32 %v616_v34, %v235_v14 }
 0x294   :  { %v259_v38 = vmul.f32 %v527_v35, %v251_v36 }
 0x295   :  { %v618_v39 = vpop.eup %617 }
 0x296   :  { %v252_v40 = vmul.f32 %v618_v39, %v236_v18  ;;  %v267_v41 = vadd.f32 %v528_v37, %v259_v38 }
 0x298   :  { %v260_v42 = vmul.f32 %v527_v35, %v252_v40  ;;  %v269_v43 = vmax.f32 %v267_v41, 0.0 }
 0x29a   :  { %v268_v44 = vadd.f32 %v528_v37, %v260_v42  ;;  %568 = vmatprep.mubr.msk.f32.mxu1 %vm225_vm4, %v269_v43 }
 0x29c   :  { %v270_v45 = vmax.f32 %v268_v44, 0.0 }
 0x29e   :  { %569 = vmatmul.mubr.msk.f32.vlgmr.msra.gmra.mrb[0].mxu1 %vm225_vm4, %v270_v45 }
 0x371   :  { %v570_v47 = vpop.f32.mrb[0].mxu1 }
 0x372   :  { %v360_v48 = vadd.f32 %v570_v47, %v529_v46  ;;  %v354_v49 = vpop.f32.mrb[1].mxu1 }
 0x373   :  { %v355_v50 = vadd.f32 %v529_v46, %v354_v49 }
 0x374   :  { %v368_v51 = vsel %vm225_vm4, %v360_v48, 0.0 }
 0x375   :  { %369 = vadd.xlane.f32.xlu1 %v368_v51  ;;  %v365_v52 = vsel %vm225_vm4, %v355_v50, 0.0 }
 0x376   :  { %366 = vadd.xlane.f32.xlu0 %v365_v52 }
 0x402   :  { %v370_v53 = vpop.xlane.xlu1 %369 }
 0x403   :  { %v372_v54 = vmul.f32 0.03125, %v370_v53  ;;  %v367_v55 = vpop.xlane.xlu0 %366 }
 0x404   :  { %v371_v56 = vmul.f32 0.03125, %v367_v55 }
 0x405   :  { %v374_v57 = vsub.f32 %v360_v48, %v372_v54 }
 0x406   :  { %v373_v58 = vsub.f32 %v355_v50, %v371_v56 }
 0x407   :  { %v376_v59 = vmul.f32 %v374_v57, %v374_v57 }
 0x408   :  { %v375_v60 = vmul.f32 %v373_v58, %v373_v58 }
 0x409   :  { %v380_v61 = vsel %vm225_vm4, %v376_v59, 0.0 }
 0x40a   :  { %381 = vadd.xlane.f32.xlu1 %v380_v61  ;;  %v377_v62 = vsel %vm225_vm4, %v375_v60, 0.0 }
 0x40b   :  { %378 = vadd.xlane.f32.xlu0 %v377_v62 }
 0x497   :  { %v382_v5 = vpop.xlane.xlu1 %381 }
 0x498   :  { %v384_v6 = vmul.f32 0.03125, %v382_v5  ;;  %v379_v7 = vpop.xlane.xlu0 %378 }
 0x499   :  { %v383_v8 = vmul.f32 0.03125, %v379_v7 }
 0x49a   :  { %v386_v9 = vadd.f32 1e-05, %v384_v6 }
 0x49b   :  { %v385_v10 = vadd.f32 1e-05, %v383_v8 }
 0x49c   :  { %619 = vrsqrt.f32 %v386_v9 }
 0x49d   :  { %621 = vrsqrt.f32 %v385_v10 }
 0x4a6   :  { %v620_v11 = vpop.eup %619 }
 0x4a7   :  { %v622_v13 = vpop.eup %621  ;;  %v390_v14 = vmul.f32 %v620_v11, %v374_v57 }
 0x4a8   :  { %v389_v15 = vmul.f32 %v622_v13, %v373_v58 }
 0x4a9   :  { %v398_v17 = vmul.f32 %v532_v12, %v390_v14 }
 0x4aa   :  { %v397_v18 = vmul.f32 %v532_v12, %v389_v15 }
 0x4ab   :  { %v406_v19 = vadd.f32 %v533_v16, %v398_v17 }
 0x4ac   :  { %v405_v20 = vadd.f32 %v533_v16, %v397_v18 }
 0x4ad   :  { %v408_v22 = vmax.f32 %v406_v19, 0.0 }
 0x4ae   :  { %v407_v21 = vmax.f32 %v405_v20, 0.0 }
 0x4b0   :  { %579 = vmatprep.mubr.msk.f32.mxu0 %vm225_vm4, %v407_v21 }
 0x4b1   :  { %580 = vmatmul.mubr.msk.f32.vlgmr.msra.gmra.mrb[2].mxu0 %vm225_vm4, %v408_v22 }
 0x584   :  { %v581_v24 = vpop.f32.mrb[2].mxu0 }
 0x585   :  { %v498_v25 = vadd.f32 %v581_v24, %v534_v23  ;;  %v492_v26 = vpop.f32.mrb[3].mxu0 }
 0x586   :  { %v493_v27 = vadd.f32 %v534_v23, %v492_v26 }
 0x587   :  { %502 = vst.msk [vmem:[#allocation14 + $0x8] sm:$0xff] %vm225_vm4, %v498_v25 }
 0x588   :  { %501 = vst.msk [vmem:[#allocation14] sm:$0xff] %vm225_vm4, %v493_v27 }
 0x589   :  { %788 = shalt.err (!%p785_p4)
}
 0x58a   :  { %s789_s22 = scalar_lea.hbm %s1048_s11, 256 }
 0x58b   :  { %p790_p5 = scmp.ne.s32.totalorder %s1048_s11, %s789_s22  ;;  %p793_p6 = scmp.lt.u32.totalorder %s789_s22, %s1048_s11 }
 0x58d   :  { %p795_p7 = pnand %p793_p6, %p790_p5 }
 0x58f   :  { %798 = shalt.err (!%p795_p7)
}
 0x590   :  { %514 = dma.vmem_to_hbm [thread:$0]  %s509_s20, 256, %s1048_s11, [#allocation4], %s811_s29, %s811_s29, %s812_s30  }
 0x591   :  { %807 = dma.done.wait [#allocation4], 256  }
 0x592   :  { %808 = vsyncadd [#allocation4], 4294967040 }
 0x593   :  { %518 = vsyncpa [#allocation3], 1 }
 0x594   :  { %519 = vsyncpa [#allocation6], 1 }
 0x595   :  { %520 = vsyncpa [#allocation9], 1 }
 0x596   :  { %521 = vsyncpa [#allocation12], 1 }
 0x597   :  { %522 = vsyncpa [#allocation4], 1 }

</bundles_post_ra>
